<compile_context>
chip_gen: v7x
topology: tpu7x:2x2x1
jax: 0.10.0
libtpu: 0.0.40
codegen_flags: <defaults>
</compile_context>

<pallas_src>
import jax
import jax.numpy as jnp
from jax.experimental import pallas as pl
from jax.experimental.pallas import tpu as pltpu

BN_EPS = 1e-5
_LANE = 128
_MAX_TILE_PIXELS = 1024  # 1024 px * 4 B * (Cin + Cout) rows stays tiny in VMEM


def _bn_relu_conv1x1_kernel(x_ref, scale_ref, shift_ref, w_ref, b_ref, o_ref):
    """One (Cin, TP) pixel tile: o = W @ relu(x * scale + shift) + b.

    x_ref:     (Cin, TP)   f32  channels on sublanes, pixels on lanes
    scale_ref: (Cin, 1)    f32  gamma * rsqrt(var + eps)
    shift_ref: (Cin, 1)    f32  beta - mean * scale
    w_ref:     (Cout, Cin) f32  1x1 conv weight
    b_ref:     (Cout, 1)   f32  conv bias
    o_ref:     (Cout, TP)  f32  lane-dense output tile
    """
    xr = jnp.maximum(x_ref[...] * scale_ref[...] + shift_ref[...], 0.0)
    o_ref[...] = (
        jnp.dot(w_ref[...], xr, preferred_element_type=jnp.float32) + b_ref[...]
    )


def basic_block_forward(x_nchw, gamma, beta, conv_w, conv_b):
    """x_nchw: (N, Cin, H, W); conv_w: (Cout, Cin, 1, 1); conv_b: (Cout,)."""
    n, cin, h, w = x_nchw.shape
    cout = conv_w.shape[0]
    p = h * w

    x = x_nchw.astype(jnp.float32)

    # --- BatchNorm (training-mode batch stats) folded to per-channel scale/shift.
    # A single bandwidth-bound reduction that XLA fuses well; the heavy Pallas
    # kernel then only touches the activations once.
    # TODO(synk): running_mean/running_var buffer updates (training side effect)
    # are not emitted; only the forward output is produced.
    mean = jnp.mean(x, axis=(0, 2, 3))                                      # (Cin,)
    var = jnp.mean(jnp.square(x - mean.reshape(1, cin, 1, 1)), axis=(0, 2, 3))
    inv_std = jax.lax.rsqrt(var + BN_EPS)
    scale_v = gamma.astype(jnp.float32) * inv_std                           # (Cin,)
    shift_v = beta.astype(jnp.float32) - mean * scale_v                     # (Cin,)
    scale = scale_v.reshape(cin, 1)
    shift = shift_v.reshape(cin, 1)

    # NCHW is already (N, Cin, H*W) contiguous -> free reshape, no transpose.
    x3 = x.reshape(n, cin, p)

    # Pixel tile: a multiple of 128 lanes, capped so double-buffered in+out
    # blocks stay far below every chip's scoped-VMEM limit.
    tp = min(_MAX_TILE_PIXELS, pl.cdiv(p, _LANE) * _LANE)
    p_pad = pl.cdiv(p, tp) * tp
    if p_pad != p:
        # Zero-pad pixels; stats already computed on the unpadded tensor and the
        # padded output columns are sliced off below, so results are unchanged.
        x3 = jnp.pad(x3, ((0, 0), (0, 0), (0, p_pad - p)))

    w2d = conv_w.reshape(cout, cin).astype(jnp.float32)                     # (Cout, Cin)
    b2d = conv_b.reshape(cout, 1).astype(jnp.float32)

    grid = (n, p_pad // tp)

    out3 = pl.pallas_call(
        _bn_relu_conv1x1_kernel,
        out_shape=jax.ShapeDtypeStruct((n, cout, p_pad), jnp.float32),
        grid=grid,
        in_specs=[
            pl.BlockSpec((None, cin, tp), lambda i, j: (i, 0, j)),   # x tile
            pl.BlockSpec((cin, 1), lambda i, j: (0, 0)),             # scale
            pl.BlockSpec((cin, 1), lambda i, j: (0, 0)),             # shift
            pl.BlockSpec((cout, cin), lambda i, j: (0, 0)),          # weight
            pl.BlockSpec((cout, 1), lambda i, j: (0, 0)),            # bias
        ],
        out_specs=pl.BlockSpec((None, cout, tp), lambda i, j: (i, 0, j)),
        compiler_params=pltpu.CompilerParams(
            dimension_semantics=("parallel", "parallel"),
            vmem_limit_bytes=32 * 1024 * 1024,
        ),
    )(x3, scale, shift, w2d, b2d)

    # (N, Cout, P)[:, :, :p] -> NCHW, again a free reshape.
    return out3[:, :, :p].reshape(n, cout, h, w)


def basic_block_reference(x_nchw, gamma, beta, conv_w, conv_b):
    """Pure-JAX reference mirroring PyTorch train-mode BN + ReLU + 1x1 conv."""
    x = x_nchw.astype(jnp.float32)
    mean = jnp.mean(x, axis=(0, 2, 3), keepdims=True)
    var = jnp.mean((x - mean) ** 2, axis=(0, 2, 3), keepdims=True)
    xn = (x - mean) * jax.lax.rsqrt(var + BN_EPS)
    xn = xn * gamma.reshape(1, -1, 1, 1) + beta.reshape(1, -1, 1, 1)
    xr = jnp.maximum(xn, 0.0)
    w2d = conv_w.reshape(conv_w.shape[0], conv_w.shape[1])                  # (Cout, Cin)
    y = jnp.einsum("nchw,oc->nohw", xr, w2d) + conv_b.reshape(1, -1, 1, 1)
    return y


if __name__ == "__main__":
    # Small shapes consistent with the module (1x1 conv, stride 1, pad 0).
    N, Cin, Cout, H, W = 2, 32, 32, 16, 16

    key = jax.random.PRNGKey(0)
    kx, kg, kb, kw, kc = jax.random.split(key, 5)

    x = jax.random.normal(kx, (N, Cin, H, W), dtype=jnp.float32)

    # BatchNorm2d affine params, perturbed deterministically from default init.
    gamma = 1.0 + 0.1 * jax.random.normal(kg, (Cin,), dtype=jnp.float32)
    beta = 0.1 * jax.random.normal(kb, (Cin,), dtype=jnp.float32)

    # Conv2d(in, out, kernel_size=1) params, deterministic init.
    conv_w = 0.1 * jax.random.normal(kw, (Cout, Cin, 1, 1), dtype=jnp.float32)
    conv_b = 0.1 * jax.random.normal(kc, (Cout,), dtype=jnp.float32)

    out = basic_block_forward(x, gamma, beta, conv_w, conv_b)
    out = jax.block_until_ready(out)

    ref = jax.block_until_ready(basic_block_reference(x, gamma, beta, conv_w, conv_b))

    assert out.shape == (N, Cout, H, W), out.shape
    err = float(jnp.max(jnp.abs(out - ref)))
    assert err < 1e-3, f"max abs error too large: {err}"

    print("KERNEL_OK")
</pallas_src>

<mosaic_0001>
module attributes {stable_mosaic.version = 11 : i64} {
  func.func @_bn_relu_conv1x1_kernel(%arg0: i32, %arg1: i32, %arg2: memref<1x32x256xf32, #tpu.memory_space<vmem>>, %arg3: memref<32x1xf32, #tpu.memory_space<vmem>>, %arg4: memref<32x1xf32, #tpu.memory_space<vmem>>, %arg5: memref<32x32xf32, #tpu.memory_space<vmem>>, %arg6: memref<32x1xf32, #tpu.memory_space<vmem>>, %arg7: memref<1x32x256xf32, #tpu.memory_space<vmem>>) attributes {dimension_semantics = [#tpu.dimension_semantics<parallel>, #tpu.dimension_semantics<parallel>], iteration_bounds = array<i64: 2, 1>, scalar_prefetch = 0 : i64, scratch_operands = 0 : i64, tpu.core_type = #tpu.core_type<tc>, window_params = [{transform_indices = @transform_0, window_bounds = array<i64: 1, 32, 256>}, {pipeline_mode = #tpu.pipeline_mode<synchronous>, transform_indices = @transform_1, window_bounds = array<i64: 32, 1>}, {pipeline_mode = #tpu.pipeline_mode<synchronous>, transform_indices = @transform_2, window_bounds = array<i64: 32, 1>}, {pipeline_mode = #tpu.pipeline_mode<synchronous>, transform_indices = @transform_3, window_bounds = array<i64: 32, 32>}, {pipeline_mode = #tpu.pipeline_mode<synchronous>, transform_indices = @transform_4, window_bounds = array<i64: 32, 1>}, {transform_indices = @transform_5, window_bounds = array<i64: 1, 32, 256>}]} {
    %c0 = arith.constant 0 : index
    %c0_0 = arith.constant 0 : index
    %c0_1 = arith.constant 0 : index
    %0 = vector.load %arg2[%c0, %c0_0, %c0_1] : memref<1x32x256xf32, #tpu.memory_space<vmem>>, vector<1x32x256xf32>
    %1 = vector.shape_cast %0 : vector<1x32x256xf32> to vector<32x256xf32>
    %c0_2 = arith.constant 0 : index
    %c0_3 = arith.constant 0 : index
    %2 = vector.load %arg3[%c0_2, %c0_3] : memref<32x1xf32, #tpu.memory_space<vmem>>, vector<32x1xf32>
    %3 = vector.broadcast %2 : vector<32x1xf32> to vector<32x256xf32>
    %4 = arith.mulf %1, %3 : vector<32x256xf32>
    %c0_4 = arith.constant 0 : index
    %c0_5 = arith.constant 0 : index
    %5 = vector.load %arg4[%c0_4, %c0_5] : memref<32x1xf32, #tpu.memory_space<vmem>>, vector<32x1xf32>
    %6 = vector.broadcast %5 : vector<32x1xf32> to vector<32x256xf32>
    %7 = arith.addf %4, %6 : vector<32x256xf32>
    %cst = arith.constant 0.000000e+00 : f32
    %8 = vector.broadcast %cst : f32 to vector<32x256xf32>
    %9 = arith.maximumf %7, %8 : vector<32x256xf32>
    %c0_6 = arith.constant 0 : index
    %c0_7 = arith.constant 0 : index
    %10 = vector.load %arg5[%c0_6, %c0_7] : memref<32x32xf32, #tpu.memory_space<vmem>>, vector<32x32xf32>
    %cst_8 = arith.constant dense<0.000000e+00> : vector<32x256xf32>
    %11 = tpu.matmul %10, %9, %cst_8 {dimension_numbers = #tpu.dot_dimension_numbers<[1], [0], [0], [1], [0, 0, 1, 1], [], []>} : vector<32x32xf32>, vector<32x256xf32>, vector<32x256xf32> -> vector<32x256xf32>
    %c0_9 = arith.constant 0 : index
    %c0_10 = arith.constant 0 : index
    %12 = vector.load %arg6[%c0_9, %c0_10] : memref<32x1xf32, #tpu.memory_space<vmem>>, vector<32x1xf32>
    %13 = vector.broadcast %12 : vector<32x1xf32> to vector<32x256xf32>
    %14 = arith.addf %11, %13 : vector<32x256xf32>
    %c0_11 = arith.constant 0 : index
    %c0_12 = arith.constant 0 : index
    %c0_13 = arith.constant 0 : index
    %15 = vector.load %arg7[%c0_11, %c0_12, %c0_13] : memref<1x32x256xf32, #tpu.memory_space<vmem>>, vector<1x32x256xf32>
    %16 = vector.shape_cast %15 : vector<1x32x256xf32> to vector<32x256xf32>
    %17 = vector.shape_cast %14 : vector<32x256xf32> to vector<1x32x256xf32>
    tpu.vector_store %arg7[%c0_11, %c0_12, %c0_13], %17 {strides = array<i32>} : memref<1x32x256xf32, #tpu.memory_space<vmem>>, vector<1x32x256xf32>,
    return
  }
  func.func @transform_0(%arg0: i32, %arg1: i32) -> (i32, i32, i32) {
    %c0_i32 = arith.constant 0 : i32
    %c0_i32_0 = arith.constant 0 : i32
    return %arg0, %c0_i32, %arg1 : i32, i32, i32
  }
  func.func @transform_1(%arg0: i32, %arg1: i32) -> (i32, i32) {
    %c0_i32 = arith.constant 0 : i32
    %c0_i32_0 = arith.constant 0 : i32
    %c0_i32_1 = arith.constant 0 : i32
    return %c0_i32, %c0_i32_0 : i32, i32
  }
  func.func @transform_2(%arg0: i32, %arg1: i32) -> (i32, i32) {
    %c0_i32 = arith.constant 0 : i32
    %c0_i32_0 = arith.constant 0 : i32
    %c0_i32_1 = arith.constant 0 : i32
    return %c0_i32, %c0_i32_0 : i32, i32
  }
  func.func @transform_3(%arg0: i32, %arg1: i32) -> (i32, i32) {
    %c0_i32 = arith.constant 0 : i32
    %c0_i32_0 = arith.constant 0 : i32
    %c0_i32_1 = arith.constant 0 : i32
    return %c0_i32, %c0_i32_0 : i32, i32
  }
  func.func @transform_4(%arg0: i32, %arg1: i32) -> (i32, i32) {
    %c0_i32 = arith.constant 0 : i32
    %c0_i32_0 = arith.constant 0 : i32
    %c0_i32_1 = arith.constant 0 : i32
    return %c0_i32, %c0_i32_0 : i32, i32
  }
  func.func @transform_5(%arg0: i32, %arg1: i32) -> (i32, i32, i32) {
    %c0_i32 = arith.constant 0 : i32
    %c0_i32_0 = arith.constant 0 : i32
    return %arg0, %c0_i32, %arg1 : i32, i32, i32
  }
}

</mosaic_0001>

<bundles_post_ra>
// kernel: tpu_custom_call.1
= control target key start
LH: loop header
LB: loop body
LE: loop exit
PB: predicated region body
PF: predicated region fallthrough
CT: control target
= control target key end

     0   :  { %10 = vsyncpa [#allocation3], 0  ;;  %s1076_s0 = inlined_call_operand.hbm [shape: f32[2,32,256], index: 0, kind: input, shape index: {}]   ;;  %s1077_s1 = inlined_call_operand.vmem [shape: f32[32,1], index: 1, kind: input, shape index: {}]   ;;  %s1078_s2 = inlined_call_operand.vmem [shape: f32[32,1], index: 2, kind: input, shape index: {}]   ;;  %s1079_s3 = inlined_call_operand.vmem [shape: f32[32,32], index: 3, kind: input, shape index: {}]   ;;  %s1080_s4 = inlined_call_operand.vmem [shape: f32[32,1], index: 4, kind: input, shape index: {}]   ;;  %s1081_s5 = inlined_call_operand.hbm [shape: f32[2,32,256], index: 5, kind: output, shape index: {}]  }
   0x1   :  { %12 = vsyncpa [#allocation3 + $0x1], 0 }
   0x2   :  { %13 = vsyncpa [#allocation4], 0 }
   0x3   :  { %15 = vsyncpa [#allocation4 + $0x1], 0  ;;  %s839_s18 = smov 0   ;;  %s841_s19 = smov 0  }
   0x4   :  { %s843_s20 = smov 0   ;;  %s845_s21 = smov 0  }
   0x5   :  { %s847_s22 = smov 0   ;;  %s849_s23 = smov 0  }
   0x6 LB: > { %s584_s24 = sadd.s32 4294967295, %s799_s23   ;;  %s585_s25 = sadd.s32 4294967294, %s799_s23   ;;  %s799_s23 = sphi %s849_s23, %s21_s23   ;;  %s795_s22 = sphi %s847_s22, %s1096_s22   ;;  %s791_s21 = sphi %s845_s21, %s1095_s21   ;;  %s787_s20 = sphi %s843_s20, %s1094_s20   ;;  %s783_s19 = sphi %s841_s19, %s1093_s19   ;;  %s779_s18 = sphi %s839_s18, %s1092_s18  }
   0x7   : > { %s33_s26 = sadd.s32 1, %s795_s22  ;;  %s42_s27 = sadd.s32 1, %s787_s20 }
   0x8   : > { %p35_p0 = scmp.ge.s32.totalorder %s33_s26, 2  ;;  %p49_p1 = scmp.ne.s32.totalorder %s787_s20, %s783_s19 }
   0x9   : > { %p50_p2 = scmp.eq.s32.totalorder %s799_s23, 0  ;;  %p55_p3 = scmp.ne.s32.totalorder %s783_s19, %s779_s18 }
   0xa   : > { %s1098_s26 = smov (%p35_p0, %s33_s26), 0  ;;  %p56_p5 = scmp.eq.s32.totalorder %s584_s24, 0 }
   0xb   : > { %p880_p4 = por %p50_p2, %p49_p1  ;;  %s37_s29 = ssub.s32 %s795_s22, %s1098_s26 }
   0xc   : > { %p165_p6 = scmp.eq.s32.totalorder %s584_s24, 1  ;;  %p40_p7 = scmp.eq.s32.totalorder %s37_s29, 0 }
   0xd   : > { %p886_p8 = por %p56_p5, %p55_p3  ;;  %p171_p10 = scmp.eq.s32.totalorder %s585_s25, 1 }
   0xe   : > { %p890_p9 = por %p165_p6, %p49_p1  ;;  %p629_p13 = scmp.lt.s32.totalorder %s799_s23, 2 }
   0xf   : > { %s895_s7 = scalar_select %p40_p7, %s787_s20, %s42_s27  }
  0x10   : > { %s1085_s6 = scalar_select %p890_p9, 1, 0 }
  0x11   : > { %p897_p11 = por %p171_p10, %p55_p3  ;;  %s203_s9 = sand.u32 1, %s787_s20  }
  0x12   : > { %s588_s10 = sshll.u32 %s203_s9, 6  ;;  %s603_s11 = sshll.u32 %s795_s22, 10 }
  0x13   : > { %s1086_s8 = scalar_select %p897_p11, 1, 0 }
  0x14   : > { %s908_s14 = scalar_lea.hbm %s1076_s0, %s603_s11  ;;  %s207_s15 = scalar_lea.vmem [#allocation2], %s588_s10 }
  0x15   : > { %s216_s16 = sshll.u32 %s207_s15, 4  ;;  %p914_p0 = pnand %p629_p13, %p880_p4  ;;  %s910_s16 = int_to_ptr.vmem [resolvable:$true] %s216_s16 }
  0x16   : > { %s919_s24 = scalar_lea.sflag [#allocation3], %s203_s9  ;;  %s687_s25 = scalar_lea.hbm %s908_s14, 1024 }
  0x17   : > { %p688_p2 = scmp.ne.s32.totalorder %s908_s14, %s687_s25  ;;  %p689_p3 = pneg %p914_p0 }
  0x18   : > { %s692_s28 = scalar_lea.hbm %s1076_s0, 2048  ;;  %p693_p4 = scmp.lt.u32.totalorder %s908_s14, %s1076_s0 }
  0x19   : > { %p690_p5 = pnand %p689_p3, %p688_p2  ;;  %p694_p7 = scmp.lt.u32.totalorder %s692_s28, %s687_s25 }
  0x1a   : > { %p696_p13 = scmp.lt.u32.totalorder %s687_s25, %s908_s14 }
  0x1b   : > { %p691_p6 = pneg %p690_p5  ;;  %p695_p10 = por %p694_p7, %p693_p4 }
  0x1d   : > { %p697_p12 = por %p696_p13, %p695_p10 }
  0x1f   : > { %p698_p1 = pnand %p697_p12, %p691_p6 }
  0x21   : > { %701 = shalt.err (!%p698_p1)
}
  0x22   : > { %s702_s9 = scalar_lea.vmem %s910_s16, 1024  ;;  %s801_s12 = smov [#allocation2]  }
  0x23   : > { %p703_p2 = scmp.ne.s32.totalorder %s910_s16, %s702_s9  ;;  %s707_s13 = sshll.u32 %s801_s12, 4  ;;  %s708_s13 = int_to_ptr.vmem [resolvable:$false] %s707_s13 }
  0x24   : > { %s709_s15 = scalar_lea.vmem %s708_s13, 2048  ;;  %p710_p9 = scmp.lt.s32.totalorder %s910_s16, %s708_s13 }
  0x25   : > { %p705_p5 = pnand %p703_p2, %p689_p3  ;;  %p711_p4 = scmp.lt.s32.totalorder %s709_s15, %s702_s9 }
  0x27   : > { %p706_p11 = pneg %p705_p5  ;;  %p712_p7 = por %p711_p4, %p710_p9 }
  0x29   : > { %p713_p10 = pnand %p712_p7, %p706_p11 }
  0x2b   : > { %716 = shalt.err (!%p713_p10)
}
  0x2c   : > { %s802_s25 = smov 256   ;;  %s803_s27 = smov 16  }
  0x2d   : > { %624 = dma.hbm_to_vmem [thread:$0]  (!%p914_p0), %s908_s14, 1024, %s910_s16, %s919_s24, %s802_s25, %s802_s25, %s803_s27  }
  0x2e   : > { %p224_p12 = scmp.lt.s32.totalorder %s799_s23, 3  ;;  %p1088_p1 = scmp.ge.s32.totalorder %s799_s23, 1 }
  0x30   : > { %p225_p3 = pnand %p1088_p1, %p224_p12 }
  0x31   : > { %s951_s29 = sand.u32 (!%p225_p3), 1, %s783_s19  }
  0x32   : > { %228 = sbr.rel (%p225_p3) target bundleno = 444 (0x1bc), region = 40  ;;  %s592_s28 = sshll.u32 (!%p225_p3), %s951_s29, 6 }
  0x33   : > { %s231_s10 = scalar_lea.sflag (!%p225_p3), [#allocation3], %s951_s29  ;;  %s957_s11 = scalar_lea.vmem (!%p225_p3), [#allocation2], %s592_s28 }
  0x39   : > { %770 = dma.done.wait (%p886_p8), %s231_s10, 1024  }
  0x3a   : > { %772 = vsyncadd (%p886_p8), %s231_s10, 4294966272  ;;  %v804_v0 = vmov 0   ;;  %v303_v1 = vld [vmem:[%s1078_s2] sm:$0xff]  ;;  %v304_v3 = vld [vmem:[%s1078_s2 + $0x8] sm:$0xff]  ;;  %v805_v13 = vmov 0.0   ;;  %vm371_vm0 = vcmask 261120  }
  0x3b   : > { %686 = vset.pattern.permute.xlu1 %v804_v0  ;;  %685 = vset.pattern.permute.xlu0 %v804_v0  ;;  %v271_v2 = vld [vmem:[%s1077_s1] sm:$0xff]  ;;  %v272_v4 = vld [vmem:[%s1077_s1 + $0x8] sm:$0xff]  ;;  %v274_v5 = vld [vmem:[%s1077_s1 + $0x18] sm:$0xff]  ;;  %s260_s30 = scalar_lea.vmem [#allocation5], %s592_s28  ;;  %s604_s25 = sshll.u32 %s791_s21, 10 }
  0x3c   : > { %309 = vperm.xlu1 %686, %v303_v1   ;;  %277 = vperm.xlu0 %685, %v271_v2   ;;  %v273_v6 = vld [vmem:[%s1077_s1 + $0x10] sm:$0xff]  ;;  %v306_v7 = vld [vmem:[%s1078_s2 + $0x18] sm:$0xff]  ;;  %v348_v9 = vld [vmem:[%s1080_s4 + $0x8] sm:$0xff]  ;;  %s497_s15 = sshll.u32 %s260_s30, 4  ;;  %s1027_s21 = scalar_lea.hbm %s1081_s5, %s604_s25  ;;  %s1022_s15 = int_to_ptr.vmem [resolvable:$true] %s497_s15 }
  0x3d   : > { %v305_v8 = vld [vmem:[%s1078_s2 + $0x10] sm:$0xff]  ;;  %v347_v10 = vld [vmem:[%s1080_s4] sm:$0xff]  ;;  %v350_v11 = vld [vmem:[%s1080_s4 + $0x18] sm:$0xff]  ;;  %448 = vmatprep.mubr.f32.mxu0 %v805_v13  ;;  %460 = vmatprep.mubr.f32.mxu1 %v805_v13  ;;  %s482_s10 = scalar_lea.sflag [#allocation4], %s951_s29  ;;  %p1089_p9 = scmp.ne.s32.totalorder %s1085_s6, 0 }
  0x3e   : > { %v349_v12 = vld [vmem:[%s1080_s4 + $0x10] sm:$0xff]  ;;  %v263_v14 = vld [vmem:[%s957_s11] sm:$0xff]  ;;  %v264_v15 = vld [vmem:[%s957_s11 + $0x8] sm:$0xff]  ;;  %s806_s14 = smov [#allocation5]  }
  0x3f   : > { %v265_v20 = vld [vmem:[%s957_s11 + $0x10] sm:$0xff]  ;;  %v266_v21 = vld [vmem:[%s957_s11 + $0x18] sm:$0xff]  ;;  %v267_v34 = vld [vmem:[%s957_s11 + $0x20] sm:$0xff]  ;;  %s721_s16 = sshll.u32 %s806_s14, 4  ;;  %s722_s16 = int_to_ptr.vmem [resolvable:$false] %s721_s16 }
  0x40   : > { %314 = vperm.xlu1 %686, %v304_v3   ;;  %282 = vperm.xlu0 %685, %v272_v4   ;;  %v269_v30 = vld [vmem:[%s957_s11 + $0x30] sm:$0xff]  ;;  %v270_v32 = vld [vmem:[%s957_s11 + $0x38] sm:$0xff]  ;;  %v268_v35 = vld [vmem:[%s957_s11 + $0x28] sm:$0xff]  ;;  %s717_s11 = scalar_lea.vmem %s1022_s15, 1024  ;;  %s723_s17 = scalar_lea.vmem %s722_s16, 2048 }
  0x41   : > { %v343_v58 = vld [vmem:[%s1079_s3] sm:$0xff]  ;;  %v345_v59 = vld [vmem:[%s1079_s3 + $0x10] sm:$0xff]  ;;  %v344_v60 = vld [vmem:[%s1079_s3 + $0x8] sm:$0xff]  ;;  %p718_p8 = scmp.ne.s32.totalorder %s1022_s15, %s717_s11  ;;  %p724_p6 = scmp.lt.s32.totalorder %s1022_s15, %s722_s16 }
  0x42   : > { %v346_v61 = vld [vmem:[%s1079_s3 + $0x18] sm:$0xff]  ;;  %p725_p13 = scmp.lt.s32.totalorder %s723_s17, %s717_s11 }
  0x43   : > { %p719_p11 = pnand %p718_p8, %p1089_p9 }
  0x44   : > { %292 = vperm.xlu1 %686, %v274_v5   ;;  %287 = vperm.xlu0 %685, %v273_v6   ;;  %p726_p2 = por %p725_p13, %p724_p6 }
  0x45   : > { %p720_p0 = pneg %p719_p11 }
  0x47   : > { %p727_p5 = pnand %p726_p2, %p720_p0 }
  0x48   : > { %324 = vperm.xlu1 %686, %v306_v7   ;;  %319 = vperm.xlu0 %685, %v305_v8  }
  0x4c   : > { %358 = vperm.xlu1 %686, %v348_v9   ;;  %353 = vperm.xlu0 %685, %v347_v10  }
  0x50   : > { %368 = vperm.xlu1 %686, %v350_v11   ;;  %363 = vperm.xlu0 %685, %v349_v12  }
  0xbb   : > { %v310_v16 = vpop.permute.xlu1 %309  ;;  %v278_v17 = vpop.permute.xlu0 %277 }
  0xbc   : > { %v295_v18 = vmul.f32 %v278_v17, %v263_v14  ;;  %v296_v19 = vmul.f32 %v278_v17, %v264_v15 }
  0xbe   : > { %v327_v26 = vadd.f32 %v310_v16, %v295_v18  ;;  %v328_v27 = vadd.f32 %v310_v16, %v296_v19 }
  0xbf   : > { %v315_v22 = vpop.permute.xlu1 %314  ;;  %v283_v23 = vpop.permute.xlu0 %282 }
  0xc0   : > { %v297_v24 = vmul.f32 %v283_v23, %v265_v20  ;;  %v298_v25 = vmul.f32 %v283_v23, %v266_v21  ;;  %v336_v36 = vmax.f32 %v328_v27, 0.0  ;;  %v335_v38 = vmax.f32 %v327_v26, 0.0 }
  0xc2   : > { %v329_v28 = vadd.f32 %v315_v22, %v297_v24  ;;  %v330_v29 = vadd.f32 %v315_v22, %v298_v25 }
  0xc3   : > { %v293_v31 = vpop.permute.xlu1 %292  ;;  %v288_v33 = vpop.permute.xlu0 %287 }
  0xc4   : > { %v338_v37 = vmax.f32 %v330_v29, 0.0  ;;  %v337_v39 = vmax.f32 %v329_v28, 0.0  ;;  %v301_v40 = vmul.f32 %v293_v31, %v269_v30  ;;  %v302_v41 = vmul.f32 %v293_v31, %v270_v32 }
  0xc5   : > { %v299_v42 = vmul.f32 %v288_v33, %v267_v34  ;;  %v300_v43 = vmul.f32 %v288_v33, %v268_v35 }
  0xc6   : > { %v605_v46 = vpack.c.bf16 %v338_v37, %v336_v36  ;;  %v607_v47 = vpack.c.bf16 %v337_v39, %v335_v38 }
  0xc7   : > { %v325_v44 = vpop.permute.xlu1 %324  ;;  %v320_v45 = vpop.permute.xlu0 %319 }
  0xc8   : > { %v333_v48 = vadd.f32 %v325_v44, %v301_v40  ;;  %v334_v49 = vadd.f32 %v325_v44, %v302_v41  ;;  %v331_v50 = vadd.f32 %v320_v45, %v299_v42  ;;  %v332_v51 = vadd.f32 %v320_v45, %v300_v43  ;;  %606 = vmatprep.subr.bf16.mxu0 %v605_v46 }
  0xc9   : > { %613 = vmatprep.subr.bf16.mxu1 %v605_v46  ;;  %608 = vmatpush1.bf16.msra.mxu0 %v607_v47 }
  0xca   : > { %v341_v52 = vmax.f32 %v333_v48, 0.0  ;;  %v342_v53 = vmax.f32 %v334_v49, 0.0  ;;  %v339_v54 = vmax.f32 %v331_v50, 0.0  ;;  %v340_v55 = vmax.f32 %v332_v51, 0.0  ;;  %615 = vmatpush1.bf16.msra.mxu1 %v607_v47 }
  0xcb   : > { %v354_v62 = vpop.permute.xlu0 %353  ;;  %v359_v63 = vpop.permute.xlu1 %358 }
  0xcc   : > { %v609_v56 = vpack.c.bf16 %v342_v53, %v340_v55  ;;  %v611_v57 = vpack.c.bf16 %v341_v52, %v339_v54 }
  0xce   : > { %610 = vmatprep.subr.bf16.mxu0 %v609_v56  ;;  %614 = vmatprep.subr.bf16.mxu1 %v609_v56 }
  0xcf   : > { %612 = vmatpush1.bf16.msra.mxu0 %v611_v57  ;;  %616 = vmatpush1.bf16.msra.mxu1 %v611_v57  ;;  %v364_v0 = vpop.permute.xlu0 %363  ;;  %v369_v9 = vpop.permute.xlu1 %368 }
  0xd2   : > { %594 = vmatmul.mubr.msk.f32.vlgmr.msra.gmra.mrb[0].mxu0 %vm371_vm0, %v343_v58  ;;  %596 = vmatmul.mubr.msk.f32.vlgmr.msra.gmra.mrb[0].mxu1 %vm371_vm0, %v345_v59 }
  0xd3   : > { %454 = vmatprep.mubr.f32.mxu0 %v805_v13  ;;  %466 = vmatprep.mubr.f32.mxu1 %v805_v13 }
  0xd6   : > { %595 = vmatmul.mubr.msk.f32.gmra.mrb[2].mxu0 %vm371_vm0, %v344_v60  ;;  %597 = vmatmul.mubr.msk.f32.gmra.mrb[2].mxu1 %vm371_vm0, %v346_v61 }
 0x1a5   : > { %v450_v1 = vpop.f32.mrb[0].mxu0  ;;  %v462_v2 = vpop.f32.mrb[0].mxu1 }
 0x1a6   : > { %v451_v3 = vadd.f32 %v450_v1, %v354_v62  ;;  %v463_v4 = vadd.f32 %v462_v2, %v364_v0  ;;  %v452_v5 = vpop.f32.mrb[1].mxu0  ;;  %v464_v6 = vpop.f32.mrb[1].mxu1 }
 0x1a7   : > { %v453_v7 = vadd.f32 %v452_v5, %v354_v62  ;;  %v465_v8 = vadd.f32 %v464_v6, %v364_v0 }
 0x1a8   : > { %473 = vst [vmem:[%s260_s30] sm:$0xff] %v451_v3  ;;  %477 = vst [vmem:[%s260_s30 + $0x20] sm:$0xff] %v463_v4 }
 0x1a9   : > { %474 = vst [vmem:[%s260_s30 + $0x8] sm:$0xff] %v453_v7  ;;  %478 = vst [vmem:[%s260_s30 + $0x28] sm:$0xff] %v465_v8  ;;  %v456_v10 = vpop.f32.mrb[2].mxu0  ;;  %v468_v11 = vpop.f32.mrb[2].mxu1 }
 0x1aa   : > { %v457_v12 = vadd.f32 %v456_v10, %v359_v63  ;;  %v469_v13 = vadd.f32 %v468_v11, %v369_v9  ;;  %v458_v14 = vpop.f32.mrb[3].mxu0  ;;  %v470_v15 = vpop.f32.mrb[3].mxu1 }
 0x1ab   : > { %v459_v16 = vadd.f32 %v458_v14, %v359_v63  ;;  %v471_v17 = vadd.f32 %v470_v15, %v369_v9 }
 0x1ac   : > { %475 = vst [vmem:[%s260_s30 + $0x10] sm:$0xff] %v457_v12  ;;  %479 = vst [vmem:[%s260_s30 + $0x30] sm:$0xff] %v469_v13 }
 0x1ad   : > { %476 = vst [vmem:[%s260_s30 + $0x18] sm:$0xff] %v459_v16  ;;  %480 = vst [vmem:[%s260_s30 + $0x38] sm:$0xff] %v471_v17 }
 0x1ae   : > { %730 = shalt.err (!%p727_p5)
}
 0x1af   : > { %s731_s24 = scalar_lea.hbm %s1027_s21, 1024  ;;  %s735_s13 = scalar_lea.hbm %s1081_s5, 2048 }
 0x1b0   : > { %p732_p4 = scmp.ne.s32.totalorder %s1027_s21, %s731_s24  ;;  %p736_p12 = scmp.lt.u32.totalorder %s1027_s21, %s1081_s5 }
 0x1b1   : > { %p737_p1 = scmp.lt.u32.totalorder %s735_s13, %s731_s24  ;;  %p739_p8 = scmp.lt.u32.totalorder %s731_s24, %s1027_s21 }
 0x1b2   : > { %p733_p7 = pnand %p732_p4, %p1089_p9 }
 0x1b3   : > { %p738_p3 = por %p737_p1, %p736_p12 }
 0x1b4   : > { %p734_p10 = pneg %p733_p7 }
 0x1b5   : > { %p740_p11 = por %p739_p8, %p738_p3 }
 0x1b7   : > { %p741_p0 = pnand %p740_p11, %p734_p10 }
 0x1b9   : > { %744 = shalt.err (!%p741_p0)
}
 0x1ba   : > { %s807_s28 = smov 256   ;;  %s808_s27 = smov 16  }
 0x1bb   : > { %619 = dma.vmem_to_hbm [thread:$0]  (%p1089_p9), %s1022_s15, 1024, %s1027_s21, %s482_s10, %s807_s28, %s807_s28, %s808_s27  }
 0x1bc PF: > { %s512_s11 = sand.u32 1, %s779_s18   ;;  %p1090_p6 = scmp.ne.s32.totalorder %s1086_s8, 0 }
 0x1bd   : > { %p1091_p13 = scmp.ge.s32.totalorder %s799_s23, 2  ;;  %s513_s14 = scalar_lea.sflag [#allocation4], %s512_s11 }
 0x1bf   : > { %p626_p2 = pnand %p1091_p13, %p1090_p6 }
 0x1c1   : > { %774 = dma.done.wait (!%p626_p2), %s513_s14, 1024  }
 0x1c2   : > { %776 = vsyncadd (!%p626_p2), %s513_s14, 4294966272  ;;  %s21_s23 = sadd.s32 1, %s799_s23   ;;  %s1092_s18 = smov %s783_s19 }
 0x1c3   : > { %p18_p5 = scmp.ge.s32.totalorder %s21_s23, 4   ;;  %s1093_s19 = smov %s787_s20 }
 0x1c4   : > { %s1094_s20 = smov %s895_s7  ;;  %s1095_s21 = smov %s795_s22 }
 0x1c5   : > { %s1096_s22 = smov %s1098_s26  ;;  %20 = sbr.rel (!%p18_p5) target bundleno = 6 (0x6), region = 85 }
 0x1cc   :  { %518 = vsyncpa [#allocation3], 1 }
 0x1cd   :  { %520 = vsyncpa [#allocation3 + $0x1], 1 }
 0x1ce   :  { %521 = vsyncpa [#allocation4], 1 }
 0x1cf   :  { %523 = vsyncpa [#allocation4 + $0x1], 1 }

</bundles_post_ra>
